<compile_context>
chip_gen: v5e
topology: v5e:2x2
jax: 0.10.0
libtpu: 0.0.40
codegen_flags: <defaults>
</compile_context>

<pallas_src>
import functools
import math

import jax
import jax.numpy as jnp
import numpy as np
from jax.experimental import pallas as pl
from jax.experimental.pallas import tpu as pltpu


# ----------------------------------------------------------------------------
# host-side: PyTorch-matching bicubic weight matrix
# ----------------------------------------------------------------------------
def _bicubic_weight_matrix(in_size: int, out_size: int) -> np.ndarray:
    A = -0.75
    scale = in_size / out_size
    i = np.arange(out_size, dtype=np.float64)
    src = (i + 0.5) * scale - 0.5
    fl = np.floor(src)
    t = src - fl

    def cub1(x):  # |x| <= 1
        return ((A + 2.0) * x - (A + 3.0)) * x * x + 1.0

    def cub2(x):  # 1 < |x| < 2
        return ((A * x - 5.0 * A) * x + 8.0 * A) * x - 4.0 * A

    weights = [cub2(t + 1.0), cub1(t), cub1(1.0 - t), cub2(2.0 - t)]
    M = np.zeros((out_size, in_size), dtype=np.float64)
    rows = np.arange(out_size)
    for k, w in enumerate(weights):
        idx = np.clip(fl.astype(np.int64) - 1 + k, 0, in_size - 1)
        np.add.at(M, (rows, idx), w)
    return M  # float64; callers cast


# ----------------------------------------------------------------------------
# host-side: fold pre-pad + interpolate + 1/scale + final crop/pad into A / Bt
# ----------------------------------------------------------------------------
def _crop_idx(n, t, roundfn):
    if n < t:
        raise NotImplementedError("central_crop: target larger than input")
    s = int(roundfn((n - t) / 2.0))
    return np.arange(s, s + t, dtype=np.int64)


def _pad_idx(n, target, roundfn):
    p = int(roundfn((target - n) / 2.0))
    idx = np.arange(-p, n + p, dtype=np.int64)
    idx[(idx < 0) | (idx >= n)] = -1  # -1 => zero row/col in the output
    return idx


def _output_index_maps(hout, wout, tw, th):
    """Map final-output row/col indices to interpolated-grid indices (-1 = 0),
    mirroring the reference's crop / pad / mixed pad+crop logic.  Row side
    uses round(), col side uses ceil(), as in the reference helpers."""
    ge = (hout >= tw) and (wout >= th)
    lt = (hout < tw) and (wout < th)
    if ge:
        rmap = _crop_idx(hout, tw, round)
        cmap = _crop_idx(wout, th, math.ceil)
    elif lt:
        rmap = _pad_idx(hout, tw, round)
        cmap = _pad_idx(wout, th, math.ceil)
    else:
        iw, ih = max(hout, tw), max(wout, th)
        rpadded = _pad_idx(hout, iw, round)
        cpadded = _pad_idx(wout, ih, math.ceil)
        rmap = rpadded[_crop_idx(len(rpadded), tw, round)]
        cmap = cpadded[_crop_idx(len(cpadded), th, math.ceil)]
    return rmap, cmap


@functools.lru_cache(maxsize=None)
def _fused_weights_cached(H, W, pad_scale, hout, wout, tw, th, inv_scale):
    """Returns A_fused (Rpad, H), Bt_fused (W, Cpad) float32 and final (R, C).

    out_final[:R, :C] = A_fused @ x_raw @ Bt_fused reproduces:
      zero-pad(pad_scale) -> bicubic(hout, wout) -> /scale -> crop/pad to target.
    Rpad / Cpad round R / C up to multiples of 8 / 128 (lane-dense stores);
    the extra rows/cols are exactly zero and get sliced off by the caller.
    """
    pad_r = int(round((H * pad_scale - H) / 2.0))
    pad_c = int(math.ceil((W * pad_scale - W) / 2.0))
    hp, wp = H + 2 * pad_r, W + 2 * pad_c

    a_full = _bicubic_weight_matrix(hp, hout) * float(inv_scale)  # (hout, hp)
    bt_full = _bicubic_weight_matrix(wp, wout).T                  # (wp, wout)
    a_in = a_full[:, pad_r:pad_r + H]                             # (hout, H)
    bt_in = bt_full[pad_c:pad_c + W, :]                           # (W, wout)

    rmap, cmap = _output_index_maps(hout, wout, tw, th)
    R, C = len(rmap), len(cmap)
    r_pad = -(-R // 8) * 8
    c_pad = -(-C // 128) * 128

    a_fused = np.zeros((r_pad, H), dtype=np.float32)
    rv = rmap >= 0
    a_fused[np.nonzero(rv)[0]] = a_in[rmap[rv]].astype(np.float32)

    bt_fused = np.zeros((W, c_pad), dtype=np.float32)
    cv = cmap >= 0
    bt_fused[:, np.nonzero(cv)[0]] = bt_in[:, cmap[cv]].astype(np.float32)
    # NOTE: keeping weights f32; bf16 weights (v6e/v7x MXU) would need accuracy
    # validation against the PyTorch reference first.
    return a_fused, bt_fused, R, C


# ----------------------------------------------------------------------------
# Pallas kernel: P planes per step; real & imag share the resident A / Bt tiles
#   out[p] = A_fused @ x[p] @ Bt_fused
# ----------------------------------------------------------------------------
def _interp_kernel(re_ref, im_ref, a_ref, bt_ref, ore_ref, oim_ref):
    a = a_ref[...]    # (Rpad, H)   -- 1/scale + pad/crop already folded in
    bt = bt_ref[...]  # (W, Cpad)
    p, h, w = re_ref.shape

    def resize(x_ref, o_ref):
        if h % 8 == 0:
            # One wide MXU pass for the Bt-side contraction over all P planes
            # (leading-dim collapse is tile-aligned when H % 8 == 0).
            x2 = x_ref[...].reshape(p * h, w)
            t = jnp.dot(x2, bt, preferred_element_type=jnp.float32)  # (P*H, Cpad)
            for i in range(p):
                o_ref[i] = jnp.dot(a, t[i * h:(i + 1) * h, :],
                                   preferred_element_type=jnp.float32)
        else:
            for i in range(p):
                t = jnp.dot(x_ref[i], bt, preferred_element_type=jnp.float32)
                o_ref[i] = jnp.dot(a, t, preferred_element_type=jnp.float32)

    resize(re_ref, ore_ref)
    resize(im_ref, oim_ref)


def _choose_planes_per_step(n, h, w, r_pad, c_pad, budget_bytes=12 << 20):
    """Largest divisor P of n whose per-step working set fits the budget,
    preferring P with >= 2 grid steps (v7x megacore)."""
    def step_bytes(p):
        in_b = 2 * p * h * w * 4 * 2            # 2 inputs, double-buffered
        out_b = 2 * p * r_pad * c_pad * 4 * 2   # 2 outputs, double-buffered
        w_b = (r_pad * h + w * c_pad) * 4 * 2   # weight tiles
        tmp_b = p * h * c_pad * 4               # matmul intermediate
        return in_b + out_b + w_b + tmp_b

    best_multi, best_any = None, None
    for p in range(1, n + 1):
        if n % p:
            continue
        if step_bytes(p) > budget_bytes:
            continue
        best_any = p
        if n // p >= 2:
            best_multi = p
    p = best_multi or best_any or 1
    return p, step_bytes(p)


def _pallas_bicubic_resize(re_planes, im_planes, a_mat, bt_mat):
    """re/im: (N, H, W) f32 -> two (N, Rpad, Cpad) f32 arrays."""
    n, h, w = re_planes.shape
    r_pad = a_mat.shape[0]
    c_pad = bt_mat.shape[1]

    p, step_bytes = _choose_planes_per_step(n, h, w, r_pad, c_pad)
    grid = (n // p,)
    # TODO(synk): for very large planes (step_bytes over budget even at P=1),
    # tile Rpad / the W contraction with a VMEM accumulator + pl.when
    # init/finalize, and exploit the 4-tap banded structure of A/Bt instead of
    # dense weight matrices.

    vmem_limit = int(min(48 << 20, max(16 << 20, 2 * step_bytes)))

    flops = 2 * 2 * n * (h * w * c_pad + r_pad * h * c_pad)
    bytes_accessed = 4 * (2 * n * h * w + 2 * n * r_pad * c_pad
                          + r_pad * h + w * c_pad)

    out_sd = jax.ShapeDtypeStruct((n, r_pad, c_pad), jnp.float32)
    plane_spec = pl.BlockSpec((p, h, w), lambda i: (i, 0, 0))
    out_spec = pl.BlockSpec((p, r_pad, c_pad), lambda i: (i, 0, 0))

    return pl.pallas_call(
        _interp_kernel,
        out_shape=(out_sd, out_sd),
        grid_spec=pltpu.PrefetchScalarGridSpec(
            num_scalar_prefetch=0,
            grid=grid,
            in_specs=[
                plane_spec,                                  # real planes
                plane_spec,                                  # imag planes
                pl.BlockSpec((r_pad, h), lambda i: (0, 0)),  # A_fused
                pl.BlockSpec((w, c_pad), lambda i: (0, 0)),  # Bt_fused
            ],
            out_specs=[out_spec, out_spec],
        ),
        compiler_params=pltpu.CompilerParams(
            dimension_semantics=("parallel",),
            vmem_limit_bytes=vmem_limit,
        ),
        cost_estimate=pl.CostEstimate(
            flops=flops, transcendentals=0, bytes_accessed=bytes_accessed),
    )(re_planes, im_planes, jnp.asarray(a_mat), jnp.asarray(bt_mat))


# ----------------------------------------------------------------------------
# JAX port of the module (all padding / cropping folded into the weights)
# ----------------------------------------------------------------------------
class InterpolateComplex2dPallas:
    def __init__(self, input_dx, input_field_shape, output_dx,
                 output_field_shape=None, mode="bicubic"):
        assert mode == "bicubic"
        self.mode = mode
        self.input_pad_scale = self._get_input_pad_scale(
            input_dx, input_field_shape, output_dx, output_field_shape)
        self.interpolated_input_field_shape = [
            int(input_dx * s * self.input_pad_scale / output_dx)
            for s in input_field_shape[-2:]
        ]
        self.output_field_shape = (
            output_field_shape if output_field_shape is not None
            else self.interpolated_input_field_shape)
        self.scale_factor = input_dx / output_dx

    @staticmethod
    def _get_input_pad_scale(input_dx, input_field_shape, output_dx,
                             output_field_shape):
        if output_field_shape is None:
            return 1
        if input_dx * input_field_shape[-2] <= output_dx * output_field_shape[-2]:
            sx = output_dx * output_field_shape[-2] / (input_dx * input_field_shape[-2])
        else:
            sx = 1
        if input_dx * input_field_shape[-1] <= output_dx * output_field_shape[-1]:
            sy = output_dx * output_field_shape[-1] / (input_dx * input_field_shape[-1])
        else:
            sy = 1
        return max(sx, sy)

    def _weights(self, H, W):
        hout, wout = self.interpolated_input_field_shape
        tw = self.output_field_shape[-2]
        th = self.output_field_shape[-1]
        return _fused_weights_cached(
            int(H), int(W), float(self.input_pad_scale),
            int(hout), int(wout), int(tw), int(th),
            1.0 / float(self.scale_factor))

    def __call__(self, x):
        # x: (B, C, H, W) complex64
        b, c, H, W = x.shape
        a_np, bt_np, R, C = self._weights(H, W)

        re = jnp.real(x).reshape(b * c, H, W).astype(jnp.float32)
        im = jnp.imag(x).reshape(b * c, H, W).astype(jnp.float32)

        re_o, im_o = _pallas_bicubic_resize(re, im, a_np, bt_np)
        re_o = re_o[:, :R, :C].reshape(b, c, R, C)
        im_o = im_o[:, :R, :C].reshape(b, c, R, C)
        return jax.lax.complex(re_o, im_o)   # (B, C, R, C) complex64

    # pure-XLA reference with the same fused weights (consistency check only)
    def reference(self, x):
        b, c, H, W = x.shape
        a_np, bt_np, R, C = self._weights(H, W)
        a = jnp.asarray(a_np)
        bt = jnp.asarray(bt_np)

        def rs(planes):
            return jnp.einsum("rh,nhw,wc->nrc", a, planes, bt)

        re = rs(jnp.real(x).reshape(b * c, H, W).astype(jnp.float32))[:, :R, :C]
        im = rs(jnp.imag(x).reshape(b * c, H, W).astype(jnp.float32))[:, :R, :C]
        return jax.lax.complex(re, im).reshape(b, c, R, C)


# ----------------------------------------------------------------------------
if __name__ == "__main__":
    # small configuration exercising pad -> bicubic upsample -> crop
    B, C, H, W = 2, 4, 16, 16
    input_dx = 1.0
    output_dx = 0.5
    output_field_shape = (48, 48)

    key = jax.random.PRNGKey(0)
    kr, ki = jax.random.split(key)
    x_real = jax.random.normal(kr, (B, C, H, W), dtype=jnp.float32)
    x_imag = jax.random.normal(ki, (B, C, H, W), dtype=jnp.float32)
    x = jax.lax.complex(x_real, x_imag)  # (2, 4, 16, 16) complex64

    module = InterpolateComplex2dPallas(
        input_dx=input_dx,
        input_field_shape=(H, W),
        output_dx=output_dx,
        output_field_shape=output_field_shape,
        mode="bicubic",
    )

    out = module(x)
    out = jax.block_until_ready(out)
    assert out.shape == (B, C, output_field_shape[0], output_field_shape[1])
    assert out.dtype == jnp.complex64

    # consistency check: Pallas result vs plain-XLA einsum with the same weights
    ref = jax.block_until_ready(module.reference(x))
    np.testing.assert_allclose(np.asarray(jnp.real(out)), np.asarray(jnp.real(ref)),
                               rtol=1e-4, atol=1e-4)
    np.testing.assert_allclose(np.asarray(jnp.imag(out)), np.asarray(jnp.imag(ref)),
                               rtol=1e-4, atol=1e-4)

    print("KERNEL_OK")
</pallas_src>

<mosaic_0001>
module attributes {stable_mosaic.version = 11 : i64} {
  func.func @_interp_kernel(%arg0: i32, %arg1: memref<4x16x16xf32, #tpu.memory_space<vmem>>, %arg2: memref<4x16x16xf32, #tpu.memory_space<vmem>>, %arg3: memref<48x16xf32, #tpu.memory_space<vmem>>, %arg4: memref<16x128xf32, #tpu.memory_space<vmem>>, %arg5: memref<4x48x128xf32, #tpu.memory_space<vmem>>, %arg6: memref<4x48x128xf32, #tpu.memory_space<vmem>>) attributes {dimension_semantics = [#tpu.dimension_semantics<parallel>], iteration_bounds = array<i64: 2>, scalar_prefetch = 0 : i64, scratch_operands = 0 : i64, tpu.core_type = #tpu.core_type<tc>, window_params = [{transform_indices = @transform_0, window_bounds = array<i64: 4, 16, 16>}, {transform_indices = @transform_1, window_bounds = array<i64: 4, 16, 16>}, {pipeline_mode = #tpu.pipeline_mode<synchronous>, transform_indices = @transform_2, window_bounds = array<i64: 48, 16>}, {pipeline_mode = #tpu.pipeline_mode<synchronous>, transform_indices = @transform_3, window_bounds = array<i64: 16, 128>}, {transform_indices = @transform_4, window_bounds = array<i64: 4, 48, 128>}, {transform_indices = @transform_5, window_bounds = array<i64: 4, 48, 128>}]} {
    %c0 = arith.constant 0 : index
    %c0_0 = arith.constant 0 : index
    %0 = vector.load %arg3[%c0, %c0_0] : memref<48x16xf32, #tpu.memory_space<vmem>>, vector<48x16xf32>
    %c0_1 = arith.constant 0 : index
    %c0_2 = arith.constant 0 : index
    %1 = vector.load %arg4[%c0_1, %c0_2] : memref<16x128xf32, #tpu.memory_space<vmem>>, vector<16x128xf32>
    %c0_3 = arith.constant 0 : index
    %c0_4 = arith.constant 0 : index
    %c0_5 = arith.constant 0 : index
    %2 = vector.load %arg1[%c0_3, %c0_4, %c0_5] : memref<4x16x16xf32, #tpu.memory_space<vmem>>, vector<4x16x16xf32>
    %3 = vector.shape_cast %2 : vector<4x16x16xf32> to vector<64x16xf32>
    %cst = arith.constant dense<0.000000e+00> : vector<64x128xf32>
    %4 = tpu.matmul %3, %1, %cst {dimension_numbers = #tpu.dot_dimension_numbers<[1], [0], [0], [1], [0, 0, 1, 1], [], []>} : vector<64x16xf32>, vector<16x128xf32>, vector<64x128xf32> -> vector<64x128xf32>
    %5 = vector.extract_strided_slice %4 {offsets = [0, 0], sizes = [16, 128], strides = [1, 1]} : vector<64x128xf32> to vector<16x128xf32>
    %cst_6 = arith.constant dense<0.000000e+00> : vector<48x128xf32>
    %6 = tpu.matmul %0, %5, %cst_6 {dimension_numbers = #tpu.dot_dimension_numbers<[1], [0], [0], [1], [0, 0, 1, 1], [], []>} : vector<48x16xf32>, vector<16x128xf32>, vector<48x128xf32> -> vector<48x128xf32>
    %c0_7 = arith.constant 0 : index
    %c0_8 = arith.constant 0 : index
    %c0_9 = arith.constant 0 : index
    %7 = vector.load %arg5[%c0_7, %c0_8, %c0_9] : memref<4x48x128xf32, #tpu.memory_space<vmem>>, vector<1x48x128xf32>
    %8 = vector.shape_cast %7 : vector<1x48x128xf32> to vector<48x128xf32>
    %9 = vector.shape_cast %6 : vector<48x128xf32> to vector<1x48x128xf32>
    tpu.vector_store %arg5[%c0_7, %c0_8, %c0_9], %9 {strides = array<i32>} : memref<4x48x128xf32, #tpu.memory_space<vmem>>, vector<1x48x128xf32>,
    %10 = vector.extract_strided_slice %4 {offsets = [16, 0], sizes = [16, 128], strides = [1, 1]} : vector<64x128xf32> to vector<16x128xf32>
    %cst_10 = arith.constant dense<0.000000e+00> : vector<48x128xf32>
    %11 = tpu.matmul %0, %10, %cst_10 {dimension_numbers = #tpu.dot_dimension_numbers<[1], [0], [0], [1], [0, 0, 1, 1], [], []>} : vector<48x16xf32>, vector<16x128xf32>, vector<48x128xf32> -> vector<48x128xf32>
    %c1 = arith.constant 1 : index
    %c0_11 = arith.constant 0 : index
    %c0_12 = arith.constant 0 : index
    %12 = vector.load %arg5[%c1, %c0_11, %c0_12] : memref<4x48x128xf32, #tpu.memory_space<vmem>>, vector<1x48x128xf32>
    %13 = vector.shape_cast %12 : vector<1x48x128xf32> to vector<48x128xf32>
    %14 = vector.shape_cast %11 : vector<48x128xf32> to vector<1x48x128xf32>
    tpu.vector_store %arg5[%c1, %c0_11, %c0_12], %14 {strides = array<i32>} : memref<4x48x128xf32, #tpu.memory_space<vmem>>, vector<1x48x128xf32>,
    %15 = vector.extract_strided_slice %4 {offsets = [32, 0], sizes = [16, 128], strides = [1, 1]} : vector<64x128xf32> to vector<16x128xf32>
    %cst_13 = arith.constant dense<0.000000e+00> : vector<48x128xf32>
    %16 = tpu.matmul %0, %15, %cst_13 {dimension_numbers = #tpu.dot_dimension_numbers<[1], [0], [0], [1], [0, 0, 1, 1], [], []>} : vector<48x16xf32>, vector<16x128xf32>, vector<48x128xf32> -> vector<48x128xf32>
    %c2 = arith.constant 2 : index
    %c0_14 = arith.constant 0 : index
    %c0_15 = arith.constant 0 : index
    %17 = vector.load %arg5[%c2, %c0_14, %c0_15] : memref<4x48x128xf32, #tpu.memory_space<vmem>>, vector<1x48x128xf32>
    %18 = vector.shape_cast %17 : vector<1x48x128xf32> to vector<48x128xf32>
    %19 = vector.shape_cast %16 : vector<48x128xf32> to vector<1x48x128xf32>
    tpu.vector_store %arg5[%c2, %c0_14, %c0_15], %19 {strides = array<i32>} : memref<4x48x128xf32, #tpu.memory_space<vmem>>, vector<1x48x128xf32>,
    %20 = vector.extract_strided_slice %4 {offsets = [48, 0], sizes = [16, 128], strides = [1, 1]} : vector<64x128xf32> to vector<16x128xf32>
    %cst_16 = arith.constant dense<0.000000e+00> : vector<48x128xf32>
    %21 = tpu.matmul %0, %20, %cst_16 {dimension_numbers = #tpu.dot_dimension_numbers<[1], [0], [0], [1], [0, 0, 1, 1], [], []>} : vector<48x16xf32>, vector<16x128xf32>, vector<48x128xf32> -> vector<48x128xf32>
    %c3 = arith.constant 3 : index
    %c0_17 = arith.constant 0 : index
    %c0_18 = arith.constant 0 : index
    %22 = vector.load %arg5[%c3, %c0_17, %c0_18] : memref<4x48x128xf32, #tpu.memory_space<vmem>>, vector<1x48x128xf32>
    %23 = vector.shape_cast %22 : vector<1x48x128xf32> to vector<48x128xf32>
    %24 = vector.shape_cast %21 : vector<48x128xf32> to vector<1x48x128xf32>
    tpu.vector_store %arg5[%c3, %c0_17, %c0_18], %24 {strides = array<i32>} : memref<4x48x128xf32, #tpu.memory_space<vmem>>, vector<1x48x128xf32>,
    %c0_19 = arith.constant 0 : index
    %c0_20 = arith.constant 0 : index
    %c0_21 = arith.constant 0 : index
    %25 = vector.load %arg2[%c0_19, %c0_20, %c0_21] : memref<4x16x16xf32, #tpu.memory_space<vmem>>, vector<4x16x16xf32>
    %26 = vector.shape_cast %25 : vector<4x16x16xf32> to vector<64x16xf32>
    %cst_22 = arith.constant dense<0.000000e+00> : vector<64x128xf32>
    %27 = tpu.matmul %26, %1, %cst_22 {dimension_numbers = #tpu.dot_dimension_numbers<[1], [0], [0], [1], [0, 0, 1, 1], [], []>} : vector<64x16xf32>, vector<16x128xf32>, vector<64x128xf32> -> vector<64x128xf32>
    %28 = vector.extract_strided_slice %27 {offsets = [0, 0], sizes = [16, 128], strides = [1, 1]} : vector<64x128xf32> to vector<16x128xf32>
    %cst_23 = arith.constant dense<0.000000e+00> : vector<48x128xf32>
    %29 = tpu.matmul %0, %28, %cst_23 {dimension_numbers = #tpu.dot_dimension_numbers<[1], [0], [0], [1], [0, 0, 1, 1], [], []>} : vector<48x16xf32>, vector<16x128xf32>, vector<48x128xf32> -> vector<48x128xf32>
    %c0_24 = arith.constant 0 : index
    %c0_25 = arith.constant 0 : index
    %c0_26 = arith.constant 0 : index
    %30 = vector.load %arg6[%c0_24, %c0_25, %c0_26] : memref<4x48x128xf32, #tpu.memory_space<vmem>>, vector<1x48x128xf32>
    %31 = vector.shape_cast %30 : vector<1x48x128xf32> to vector<48x128xf32>
    %32 = vector.shape_cast %29 : vector<48x128xf32> to vector<1x48x128xf32>
    tpu.vector_store %arg6[%c0_24, %c0_25, %c0_26], %32 {strides = array<i32>} : memref<4x48x128xf32, #tpu.memory_space<vmem>>, vector<1x48x128xf32>,
    %33 = vector.extract_strided_slice %27 {offsets = [16, 0], sizes = [16, 128], strides = [1, 1]} : vector<64x128xf32> to vector<16x128xf32>
    %cst_27 = arith.constant dense<0.000000e+00> : vector<48x128xf32>
    %34 = tpu.matmul %0, %33, %cst_27 {dimension_numbers = #tpu.dot_dimension_numbers<[1], [0], [0], [1], [0, 0, 1, 1], [], []>} : vector<48x16xf32>, vector<16x128xf32>, vector<48x128xf32> -> vector<48x128xf32>
    %c1_28 = arith.constant 1 : index
    %c0_29 = arith.constant 0 : index
    %c0_30 = arith.constant 0 : index
    %35 = vector.load %arg6[%c1_28, %c0_29, %c0_30] : memref<4x48x128xf32, #tpu.memory_space<vmem>>, vector<1x48x128xf32>
    %36 = vector.shape_cast %35 : vector<1x48x128xf32> to vector<48x128xf32>
    %37 = vector.shape_cast %34 : vector<48x128xf32> to vector<1x48x128xf32>
    tpu.vector_store %arg6[%c1_28, %c0_29, %c0_30], %37 {strides = array<i32>} : memref<4x48x128xf32, #tpu.memory_space<vmem>>, vector<1x48x128xf32>,
    %38 = vector.extract_strided_slice %27 {offsets = [32, 0], sizes = [16, 128], strides = [1, 1]} : vector<64x128xf32> to vector<16x128xf32>
    %cst_31 = arith.constant dense<0.000000e+00> : vector<48x128xf32>
    %39 = tpu.matmul %0, %38, %cst_31 {dimension_numbers = #tpu.dot_dimension_numbers<[1], [0], [0], [1], [0, 0, 1, 1], [], []>} : vector<48x16xf32>, vector<16x128xf32>, vector<48x128xf32> -> vector<48x128xf32>
    %c2_32 = arith.constant 2 : index
    %c0_33 = arith.constant 0 : index
    %c0_34 = arith.constant 0 : index
    %40 = vector.load %arg6[%c2_32, %c0_33, %c0_34] : memref<4x48x128xf32, #tpu.memory_space<vmem>>, vector<1x48x128xf32>
    %41 = vector.shape_cast %40 : vector<1x48x128xf32> to vector<48x128xf32>
    %42 = vector.shape_cast %39 : vector<48x128xf32> to vector<1x48x128xf32>
    tpu.vector_store %arg6[%c2_32, %c0_33, %c0_34], %42 {strides = array<i32>} : memref<4x48x128xf32, #tpu.memory_space<vmem>>, vector<1x48x128xf32>,
    %43 = vector.extract_strided_slice %27 {offsets = [48, 0], sizes = [16, 128], strides = [1, 1]} : vector<64x128xf32> to vector<16x128xf32>
    %cst_35 = arith.constant dense<0.000000e+00> : vector<48x128xf32>
    %44 = tpu.matmul %0, %43, %cst_35 {dimension_numbers = #tpu.dot_dimension_numbers<[1], [0], [0], [1], [0, 0, 1, 1], [], []>} : vector<48x16xf32>, vector<16x128xf32>, vector<48x128xf32> -> vector<48x128xf32>
    %c3_36 = arith.constant 3 : index
    %c0_37 = arith.constant 0 : index
    %c0_38 = arith.constant 0 : index
    %45 = vector.load %arg6[%c3_36, %c0_37, %c0_38] : memref<4x48x128xf32, #tpu.memory_space<vmem>>, vector<1x48x128xf32>
    %46 = vector.shape_cast %45 : vector<1x48x128xf32> to vector<48x128xf32>
    %47 = vector.shape_cast %44 : vector<48x128xf32> to vector<1x48x128xf32>
    tpu.vector_store %arg6[%c3_36, %c0_37, %c0_38], %47 {strides = array<i32>} : memref<4x48x128xf32, #tpu.memory_space<vmem>>, vector<1x48x128xf32>,
    return
  }
  func.func @transform_0(%arg0: i32) -> (i32, i32, i32) {
    %c0_i32 = arith.constant 0 : i32
    %c0_i32_0 = arith.constant 0 : i32
    %c0_i32_1 = arith.constant 0 : i32
    return %arg0, %c0_i32, %c0_i32_0 : i32, i32, i32
  }
  func.func @transform_1(%arg0: i32) -> (i32, i32, i32) {
    %c0_i32 = arith.constant 0 : i32
    %c0_i32_0 = arith.constant 0 : i32
    %c0_i32_1 = arith.constant 0 : i32
    return %arg0, %c0_i32, %c0_i32_0 : i32, i32, i32
  }
  func.func @transform_2(%arg0: i32) -> (i32, i32) {
    %c0_i32 = arith.constant 0 : i32
    %c0_i32_0 = arith.constant 0 : i32
    %c0_i32_1 = arith.constant 0 : i32
    return %c0_i32, %c0_i32_0 : i32, i32
  }
  func.func @transform_3(%arg0: i32) -> (i32, i32) {
    %c0_i32 = arith.constant 0 : i32
    %c0_i32_0 = arith.constant 0 : i32
    %c0_i32_1 = arith.constant 0 : i32
    return %c0_i32, %c0_i32_0 : i32, i32
  }
  func.func @transform_4(%arg0: i32) -> (i32, i32, i32) {
    %c0_i32 = arith.constant 0 : i32
    %c0_i32_0 = arith.constant 0 : i32
    %c0_i32_1 = arith.constant 0 : i32
    return %arg0, %c0_i32, %c0_i32_0 : i32, i32, i32
  }
  func.func @transform_5(%arg0: i32) -> (i32, i32, i32) {
    %c0_i32 = arith.constant 0 : i32
    %c0_i32_0 = arith.constant 0 : i32
    %c0_i32_1 = arith.constant 0 : i32
    return %arg0, %c0_i32, %c0_i32_0 : i32, i32, i32
  }
}

</mosaic_0001>

<bundles_post_ra>
// kernel: tpu_custom_call.1
= control target key start
LH: loop header
LB: loop body
LE: loop exit
PB: predicated region body
PF: predicated region fallthrough
CT: control target
= control target key end

     0   :  { %s1790_s0 = inlined_call_operand.hbm [shape: f32[8,16,16], index: 0, kind: input, shape index: {}]   ;;  %s1791_s1 = inlined_call_operand.hbm [shape: f32[8,16,16], index: 1, kind: input, shape index: {}]   ;;  %s1792_s2 = inlined_call_operand.vmem [shape: f32[48,16], index: 2, kind: input, shape index: {}]   ;;  %s1793_s3 = inlined_call_operand.vmem [shape: f32[16,128], index: 3, kind: input, shape index: {}]   ;;  %s1794_s4 = inlined_call_operand.hbm [shape: f32[8,48,128], index: 4, kind: output, shape index: {0}]   ;;  %s1795_s5 = inlined_call_operand.hbm [shape: f32[8,48,128], index: 5, kind: output, shape index: {1}]  }
   0x1   :  { %1798 = sst [smem:[#allocation16_spill]] %s1790_s0 }
   0x2   :  { %11 = vsyncpa [#allocation3], 0 }
   0x3   :  { %13 = vsyncpa [#allocation3 + $0x1], 0 }
   0x4   :  { %14 = vsyncpa [#allocation6], 0 }
   0x5   :  { %16 = vsyncpa [#allocation6 + $0x1], 0 }
   0x6   :  { %17 = vsyncpa [#allocation4], 0 }
   0x7   :  { %19 = vsyncpa [#allocation4 + $0x1], 0 }
   0x8   :  { %20 = vsyncpa [#allocation9], 0 }
   0x9   :  { %22 = vsyncpa [#allocation9 + $0x1], 0  ;;  %s1371_s18 = smov 0   ;;  %s1373_s19 = smov 0  }
   0xa   :  { %s1375_s20 = smov 0   ;;  %s1377_s21 = smov 0  }
   0xb LB: > { %1799 = sst [smem:[#allocation14_spill]] %s1331_s20  ;;  %s1392_s22 = sadd.s32 4294967295, %s1335_s21   ;;  %s1335_s21 = sphi %s1377_s21, %s1814_s21   ;;  %s1331_s20 = sphi %s1375_s20, %s1811_s20   ;;  %s1327_s19 = sphi %s1373_s19, %s1813_s19   ;;  %s1323_s18 = sphi %s1371_s18, %s1812_s18  }
   0xc   : > { %s980_s23 = sadd.s32 4294967294, %s1335_s21   ;;  %s1396_s24 = sadd.s32 1, %s1335_s21  }
   0xd   : > { %s35_s25 = sadd.s32 1, %s1331_s20  ;;  %s32_s26 = ssub.s32 %s1335_s21, %s1396_s24 }
   0xe   : > { %p42_p0 = scmp.ne.s32.totalorder %s1331_s20, %s1327_s19  ;;  %p33_p1 = scmp.eq.s32.totalorder %s32_s26, 0 }
   0xf   : > { %p43_p2 = scmp.eq.s32.totalorder %s1335_s21, 0  ;;  %p48_p3 = scmp.ne.s32.totalorder %s1327_s19, %s1323_s18 }
  0x10   : > { %p49_p4 = scmp.eq.s32.totalorder %s1392_s22, 0  ;;  %p140_p7 = scmp.eq.s32.totalorder %s1392_s22, 1 }
  0x11   : > { %s1408_s27 = scalar_select %p33_p1, %s1331_s20, %s35_s25  }
  0x12   : > { %p1410_p5 = por %p43_p2, %p42_p0  ;;  %p1414_p6 = por %p49_p4, %p48_p3 }
  0x13   : > { %1800 = sst [smem:[#allocation15_spill]] %s1408_s27  ;;  %p146_p8 = scmp.eq.s32.totalorder %s980_s23, 1 }
  0x14   : > { %p1135_p10 = scmp.lt.s32.totalorder %s1335_s21, 2  ;;  %p1421_p11 = por %p140_p7, %p42_p0 }
  0x15   : > { %p1425_p12 = por %p146_p8, %p48_p3  ;;  %s1430_s7 = sand.u32 1, %s1331_s20  }
  0x16   : > { %s1103_s8 = sshll.u32 %s1335_s21, 6  ;;  %s1796_s9 = sshll.u32 %s1430_s7, 6 }
  0x17   : > { %s1805_s0 = sld [smem:[#allocation16_spill]]  ;;  %s202_s14 = scalar_lea.vmem [#allocation2], %s1796_s9 }
  0x18   : > { %s211_s15 = sshll.u32 %s202_s14, 4  ;;  %p1443_p13 = pnand %p1135_p10, %p1410_p5  ;;  %s212_s15 = int_to_ptr.vmem [resolvable:$true] %s211_s15 }
  0x19   : > { %p991_p0 = scmp.ge.s32.totalorder %s1335_s21, 1  ;;  %p242_p1 = scmp.lt.s32.totalorder %s1335_s21, 3 }
  0x1a   : > { %s199_s17 = scalar_lea.sflag [#allocation3], %s1430_s7  ;;  %p1177_p3 = pneg %p1443_p13 }
  0x1d   : > { %s208_s12 = scalar_lea.hbm %s1805_s0, %s1103_s8  ;;  %s1180_s10 = scalar_lea.hbm %s1805_s0, 128 }
  0x1e   : > { %s209_s13 = sshll.u32 %s208_s12, 4  ;;  %s210_s13 = int_to_ptr.hbm [resolvable:$true] %s209_s13 }
  0x1f   : > { %s1173_s23 = sshra.s32 %s210_s13, 4  ;;  %s1174_s23 = int_to_ptr.hbm [resolvable:$true] %s1173_s23 }
  0x20   : > { %s1175_s25 = scalar_lea.hbm %s1174_s23, 64  ;;  %p1181_p5 = scmp.lt.s32.totalorder %s1174_s23, %s1805_s0 }
  0x21   : > { %p1176_p2 = scmp.ne.s32.totalorder %s1174_s23, %s1175_s25  ;;  %p1182_p8 = scmp.lt.s32.totalorder %s1180_s10, %s1175_s25 }
  0x23   : > { %p1178_p4 = pnand %p1177_p3, %p1176_p2  ;;  %p1183_p10 = por %p1182_p8, %p1181_p5 }
  0x25   : > { %p1179_p7 = pneg %p1178_p4 }
  0x27   : > { %p1184_p9 = pnand %p1183_p10, %p1179_p7 }
  0x29   : > { %1187 = shalt.err (!%p1184_p9)
}
  0x2a   : > { %s1337_s14 = smov 128   ;;  %s1338_s9 = smov 8  }
  0x2b   : > { %1124 = dma.hbm_to_vmem [thread:$0]  (!%p1443_p13), %s210_s13, 1024, %s212_s15, %s199_s17, %s1337_s14, %s1337_s14, %s1338_s9  }
  0x2c   : > { %p1467_p2 = pnand %p991_p0, %p242_p1  ;;  %s231_s28 = scalar_lea.hbm %s1791_s1, %s1103_s8 }
  0x2d   : > { %s232_s10 = sshll.u32 %s231_s28, 4  ;;  %s1808_s11 = sshll.u32 %s1430_s7, 6  ;;  %s233_s10 = int_to_ptr.hbm [resolvable:$true] %s232_s10 }
  0x2e   : > { %s225_s12 = scalar_lea.vmem [#allocation5], %s1808_s11  ;;  %s222_s27 = scalar_lea.sflag [#allocation6], %s1430_s7 }
  0x2f   : > { %s234_s0 = sshll.u32 %s225_s12, 4  ;;  %s1203_s20 = sshra.s32 %s233_s10, 4  ;;  %s235_s0 = int_to_ptr.vmem [resolvable:$true] %s234_s0  ;;  %s1204_s20 = int_to_ptr.hbm [resolvable:$true] %s1203_s20 }
  0x30   : > { %s1205_s13 = scalar_lea.hbm %s1204_s20, 64  ;;  %s1210_s23 = scalar_lea.hbm %s1791_s1, 128 }
  0x31   : > { %p1206_p9 = scmp.ne.s32.totalorder %s1204_s20, %s1205_s13  ;;  %p1211_p4 = scmp.lt.s32.totalorder %s1204_s20, %s1791_s1 }
  0x32   : > { %p1212_p7 = scmp.lt.s32.totalorder %s1210_s23, %s1205_s13 }
  0x33   : > { %p1208_p0 = pnand %p1206_p9, %p1177_p3 }
  0x34   : > { %p1213_p5 = por %p1212_p7, %p1211_p4 }
  0x35   : > { %p1209_p1 = pneg %p1208_p0 }
  0x37   : > { %p1214_p8 = pnand %p1213_p5, %p1209_p1 }
  0x39   : > { %1217 = shalt.err (!%p1214_p8)
}
  0x3a   : > { %1127 = dma.hbm_to_vmem [thread:$0]  (!%p1443_p13), %s233_s10, 1024, %s235_s0, %s222_s27, %s1337_s14, %s1337_s14, %s1338_s9  }
  0x3b   : > { %246 = sbr.rel (%p1467_p2) target bundleno = 654 (0x28e), region = 36  ;;  %s1493_s7 = sand.u32 (!%p1467_p2), 1, %s1327_s19  }
  0x3c   : > { %s992_s28 = sshll.u32 (!%p1467_p2), %s1493_s7, 6  ;;  %s249_s11 = scalar_lea.sflag (!%p1467_p2), [#allocation3], %s1493_s7 }
  0x3d   : > { %s1497_s12 = scalar_lea.vmem (!%p1467_p2), [#allocation2], %s992_s28 }
  0x40   : > { %1306 = dma.done.wait (%p1414_p6), %s249_s11, 1024  }
  0x41   : > { %1308 = vsyncadd (%p1414_p6), %s249_s11, 4294966272  ;;  %s259_s0 = scalar_lea.sflag [#allocation6], %s1493_s7  ;;  %s1504_s20 = scalar_lea.vmem [#allocation5], %s992_s28 }
  0x42   : > { %1310 = dma.done.wait (%p1414_p6), %s259_s0, 1024  }
  0x43   : > { %1312 = vsyncadd (%p1414_p6), %s259_s0, 4294966272  ;;  %v311_v0 = vld [vmem:[%s1793_s3 + $0x8] sm:$0xff]  ;;  %v310_v1 = vld [vmem:[%s1793_s3] sm:$0xff]  ;;  %vm320_vm0 = vcmask 130048   ;;  %s812_s13 = scalar_lea.sflag [#allocation4], %s1493_s7  ;;  %s1253_s25 = scalar_lea.hbm %s1794_s4, 384 }
  0x44   : > { %359 = vmatpush.msra.mxu0 %v311_v0  ;;  %v312_v2 = vld [vmem:[%s1497_s12] sm:$0xff]  ;;  %v313_v3 = vld [vmem:[%s1497_s12 + $0x8] sm:$0xff]  ;;  %v314_v4 = vld [vmem:[%s1497_s12 + $0x10] sm:$0xff] }
  0x45   : > { %v315_v5 = vld [vmem:[%s1497_s12 + $0x18] sm:$0xff]  ;;  %v316_v6 = vld [vmem:[%s1497_s12 + $0x20] sm:$0xff]  ;;  %v317_v7 = vld [vmem:[%s1497_s12 + $0x28] sm:$0xff] }
  0x46   : > { %360 = vmatpush.msra.mxu0 %v310_v1  ;;  %v1531_v10 = vld [vmem:[%s1792_s2 + $0x10] sm:$0xff]  ;;  %v1538_v12 = vld [vmem:[%s1792_s2 + $0x18] sm:$0xff]  ;;  %v1545_v14 = vld [vmem:[%s1792_s2] sm:$0xff] }
  0x47   : > { %994 = vmatmul.msk.f32.vlgmr.msra.gmra.mxu0 %vm320_vm0, %v312_v2  ;;  %v1550_v15 = vld [vmem:[%s1792_s2 + $0x20] sm:$0xff]  ;;  %v1559_v17 = vld [vmem:[%s1792_s2 + $0x8] sm:$0xff]  ;;  %v318_v20 = vld [vmem:[%s1497_s12 + $0x30] sm:$0xff] }
  0x48   : > { %v1564_v18 = vld [vmem:[%s1792_s2 + $0x28] sm:$0xff]  ;;  %v319_v21 = vld [vmem:[%s1497_s12 + $0x38] sm:$0xff]  ;;  %v571_v22 = vld [vmem:[%s1504_s20] sm:$0xff]  ;;  %s1110_s12 = smul.u32 192, %s1493_s7 }
  0x49   : > { %v572_v23 = vld [vmem:[%s1504_s20 + $0x8] sm:$0xff]  ;;  %v573_v24 = vld [vmem:[%s1504_s20 + $0x10] sm:$0xff]  ;;  %v574_v25 = vld [vmem:[%s1504_s20 + $0x18] sm:$0xff] }
  0x4a   : > { %v575_v26 = vld [vmem:[%s1504_s20 + $0x20] sm:$0xff]  ;;  %v576_v27 = vld [vmem:[%s1504_s20 + $0x28] sm:$0xff]  ;;  %v577_v28 = vld [vmem:[%s1504_s20 + $0x30] sm:$0xff]  ;;  %s1617_s27 = scalar_lea.vmem [#allocation7], %s1110_s12  ;;  %s1710_s10 = scalar_lea.vmem [#allocation8], %s1110_s12 }
  0x4b   : > { %v578_v29 = vld [vmem:[%s1504_s20 + $0x38] sm:$0xff]  ;;  %s1111_s20 = smul.u32 192, %s1392_s22  ;;  %s830_s29 = sshll.u32 %s1617_s27, 4  ;;  %s831_s29 = int_to_ptr.vmem [resolvable:$true] %s830_s29 }
  0x4d   : > { %s829_s14 = scalar_lea.hbm %s1794_s4, %s1111_s20 }
  0x4e   : > { %s832_s26 = sshll.u32 %s829_s14, 4  ;;  %s833_s26 = int_to_ptr.hbm [resolvable:$true] %s832_s26 }
  0x4f   : > { %995 = vmatmul.msk.f32.gmra.mxu0 %vm320_vm0, %v313_v3  ;;  %s1247_s15 = sshra.s32 %s833_s26, 4  ;;  %s1248_s15 = int_to_ptr.hbm [resolvable:$true] %s1247_s15 }
  0x50   : > { %s1249_s17 = scalar_lea.hbm %s1248_s15, 192  ;;  %p1254_p10 = scmp.lt.s32.totalorder %s1248_s15, %s1794_s4 }
  0x51   : > { %p1250_p6 = scmp.ne.s32.totalorder %s1248_s15, %s1249_s17  ;;  %p1255_p2 = scmp.lt.s32.totalorder %s1253_s25, %s1249_s17 }
  0x53   : > { %p1251_p13 = pnand %p1250_p6, %p1421_p11  ;;  %p1256_p9 = por %p1255_p2, %p1254_p10 }
  0x55   : > { %p1252_p3 = pneg %p1251_p13 }
  0x57   : > { %996 = vmatmul.msk.f32.gmra.mxu0 %vm320_vm0, %v314_v4  ;;  %p1257_p0 = pnand %p1256_p9, %p1252_p3 }
  0x5f   : > { %997 = vmatmul.msk.f32.gmra.mxu0 %vm320_vm0, %v315_v5 }
  0x67   : > { %998 = vmatmul.msk.f32.gmra.mxu0 %vm320_vm0, %v316_v6 }
  0x6f   : > { %999 = vmatmul.msk.f32.gmra.mxu0 %vm320_vm0, %v317_v7 }
  0x77   : > { %1000 = vmatmul.msk.f32.gmra.mxu0 %vm320_vm0, %v318_v20 }
  0x7f   : > { %1001 = vmatmul.msk.f32.gmra.mxu0 %vm320_vm0, %v319_v21 }
  0xc4   : > { %v362_v8 = vpop.f32.mrf.mxu0 }
  0xcc   : > { %v365_v9 = vpop.f32.mrf.mxu0 }
  0xcd   : > { %418 = vmatpush.msrb.mxu0 %v365_v9  ;;  %1106 = vmatpush.msra.mxu1 %v365_v9 }
  0xcf   : > { %419 = vmatpush.msrb.mxu0 %v362_v8  ;;  %1107 = vmatpush.msra.mxu1 %v362_v8 }
  0xd0   : > { %1004 = vmatmul.msk.f32.vlgmr.msra.gmra.mxu1 %vm320_vm0, %v1531_v10  ;;  %1002 = vmatmul.msk.f32.vlgmr.msrb.gmra.mxu0 %vm320_vm0, %v1545_v14 }
  0xd4   : > { %v368_v11 = vpop.f32.mrf.mxu0 }
  0xd8   : > { %1005 = vmatmul.msk.f32.gmra.mxu1 %vm320_vm0, %v1538_v12  ;;  %1003 = vmatmul.msk.f32.gmra.mxu0 %vm320_vm0, %v1559_v17 }
  0xdc   : > { %v371_v13 = vpop.f32.mrf.mxu0 }
  0xdd   : > { %459 = vmatpush.msra.mxu2 %v371_v13 }
  0xdf   : > { %460 = vmatpush.msra.mxu2 %v368_v11 }
  0xe0   : > { %1008 = vmatmul.msk.f32.vlgmr.msra.gmra.mxu2 %vm320_vm0, %v1545_v14  ;;  %1006 = vmatmul.msk.f32.gmra.mxu1 %vm320_vm0, %v1550_v15 }
  0xe4   : > { %v374_v16 = vpop.f32.mrf.mxu0 }
  0xe8   : > { %1009 = vmatmul.msk.f32.gmra.mxu2 %vm320_vm0, %v1559_v17  ;;  %1007 = vmatmul.msk.f32.gmra.mxu1 %vm320_vm0, %v1564_v18 }
  0xec   : > { %v377_v19 = vpop.f32.mrf.mxu0 }
  0xed   : > { %501 = vmatpush.msrb.mxu2 %v377_v19  ;;  %1108 = vmatpush.msra.mxu3 %v377_v19 }
  0xef   : > { %502 = vmatpush.msrb.mxu2 %v374_v16  ;;  %1109 = vmatpush.msra.mxu3 %v374_v16 }
  0xf0   : > { %1010 = vmatmul.msk.f32.gmra.mxu2 %vm320_vm0, %v1531_v10  ;;  %1022 = vmatmul.msk.f32.vlgmr.msra.gmra.mxu3 %vm320_vm0, %v1531_v10 }
  0xf1   : > { %617 = vmatpush.msra.mxu2 %v311_v0 }
  0xf3   : > { %618 = vmatpush.msra.mxu2 %v310_v1 }
  0xf4   : > { %v380_v34 = vpop.f32.mrf.mxu0 }
  0xf8   : > { %1011 = vmatmul.msk.f32.gmra.mxu2 %vm320_vm0, %v1538_v12  ;;  %1023 = vmatmul.msk.f32.gmra.mxu3 %vm320_vm0, %v1538_v12 }
  0xfc   : > { %v383_v36 = vpop.f32.mrf.mxu0 }
  0xfd   : > { %543 = vmatpush.msrb.mxu1 %v383_v36 }
  0xff   : > { %544 = vmatpush.msrb.mxu1 %v380_v34 }
 0x100   : > { %1012 = vmatmul.msk.f32.gmra.mxu2 %vm320_vm0, %v1550_v15  ;;  %1024 = vmatmul.msk.f32.gmra.mxu3 %vm320_vm0, %v1550_v15 }
 0x101   : > { %1032 = vmatmul.msk.f32.vlgmr.msrb.gmra.mxu1 %vm320_vm0, %v1545_v14 }
 0x108   : > { %1013 = vmatmul.msk.f32.gmra.mxu2 %vm320_vm0, %v1564_v18  ;;  %1025 = vmatmul.msk.f32.gmra.mxu3 %vm320_vm0, %v1564_v18 }
 0x109   : > { %1033 = vmatmul.msk.f32.gmra.mxu1 %vm320_vm0, %v1559_v17 }
 0x110   : > { %1020 = vmatmul.msk.f32.vlgmr.msrb.gmra.mxu2 %vm320_vm0, %v1545_v14 }
 0x111   : > { %1034 = vmatmul.msk.f32.gmra.mxu1 %vm320_vm0, %v1531_v10 }
 0x118   : > { %1021 = vmatmul.msk.f32.gmra.mxu2 %vm320_vm0, %v1559_v17 }
 0x119   : > { %1035 = vmatmul.msk.f32.gmra.mxu1 %vm320_vm0, %v1538_v12 }
 0x120   : > { %1044 = vmatmul.msk.f32.vlgmr.msra.gmra.mxu2 %vm320_vm0, %v571_v22 }
 0x121   : > { %1036 = vmatmul.msk.f32.gmra.mxu1 %vm320_vm0, %v1550_v15 }
 0x128   : > { %1045 = vmatmul.msk.f32.gmra.mxu2 %vm320_vm0, %v572_v23 }
 0x129   : > { %1037 = vmatmul.msk.f32.gmra.mxu1 %vm320_vm0, %v1564_v18 }
 0x130   : > { %1046 = vmatmul.msk.f32.gmra.mxu2 %vm320_vm0, %v573_v24 }
 0x138   : > { %1047 = vmatmul.msk.f32.gmra.mxu2 %vm320_vm0, %v574_v25 }
 0x140   : > { %1048 = vmatmul.msk.f32.gmra.mxu2 %vm320_vm0, %v575_v26 }
 0x148   : > { %1049 = vmatmul.msk.f32.gmra.mxu2 %vm320_vm0, %v576_v27 }
 0x14d   : > { %v427_v48 = vpop.f32.mrf.mxu1  ;;  %v421_v60 = vpop.f32.mrf.mxu0 }
 0x14e   : > { %441 = vst [vmem:[%s1617_s27 + $0x10] sm:$0xff] %v427_v48 }
 0x14f   : > { %439 = vst [vmem:[%s1617_s27] sm:$0xff] %v421_v60 }
 0x150   : > { %1050 = vmatmul.msk.f32.gmra.mxu2 %vm320_vm0, %v577_v28 }
 0x155   : > { %v430_v50 = vpop.f32.mrf.mxu1  ;;  %v424_v63 = vpop.f32.mrf.mxu0 }
 0x156   : > { %442 = vst [vmem:[%s1617_s27 + $0x18] sm:$0xff] %v430_v50 }
 0x157   : > { %440 = vst [vmem:[%s1617_s27 + $0x8] sm:$0xff] %v424_v63 }
 0x158   : > { %1051 = vmatmul.msk.f32.gmra.mxu2 %vm320_vm0, %v578_v29 }
 0x15d   : > { %v433_v52 = vpop.f32.mrf.mxu1 }
 0x15e   : > { %443 = vst [vmem:[%s1617_s27 + $0x20] sm:$0xff] %v433_v52 }
 0x163   : > { %v462_v30 = vpop.f32.mrf.mxu2 }
 0x164   : > { %1014 = vst [vmem:[%s1617_s27 + $0x30] sm:$0xff] %v462_v30 }
 0x165   : > { %v436_v54 = vpop.f32.mrf.mxu1 }
 0x166   : > { %444 = vst [vmem:[%s1617_s27 + $0x28] sm:$0xff] %v436_v54 }
 0x16b   : > { %v465_v31 = vpop.f32.mrf.mxu2 }
 0x16c   : > { %1015 = vst [vmem:[%s1617_s27 + $0x38] sm:$0xff] %v465_v31 }
 0x173   : > { %v468_v32 = vpop.f32.mrf.mxu2  ;;  %v510_v49 = vpop.f32.mrf.mxu3 }
 0x174   : > { %1016 = vst [vmem:[%s1617_s27 + $0x40] sm:$0xff] %v468_v32 }
 0x175   : > { %1028 = vst [vmem:[%s1617_s27 + $0x70] sm:$0xff] %v510_v49 }
 0x17b   : > { %v471_v33 = vpop.f32.mrf.mxu2  ;;  %v513_v51 = vpop.f32.mrf.mxu3 }
 0x17c   : > { %1017 = vst [vmem:[%s1617_s27 + $0x48] sm:$0xff] %v471_v33 }
 0x17d   : > { %1029 = vst [vmem:[%s1617_s27 + $0x78] sm:$0xff] %v513_v51 }
 0x17e   : > { %v546_v56 = vpop.f32.mrf.mxu1 }
 0x17f   : > { %1038 = vst [vmem:[%s1617_s27 + $0x90] sm:$0xff] %v546_v56 }
 0x183   : > { %v474_v35 = vpop.f32.mrf.mxu2  ;;  %v516_v53 = vpop.f32.mrf.mxu3 }
 0x184   : > { %1018 = vst [vmem:[%s1617_s27 + $0x50] sm:$0xff] %v474_v35 }
 0x185   : > { %1030 = vst [vmem:[%s1617_s27 + $0x80] sm:$0xff] %v516_v53 }
 0x186   : > { %v549_v57 = vpop.f32.mrf.mxu1 }
 0x187   : > { %1039 = vst [vmem:[%s1617_s27 + $0x98] sm:$0xff] %v549_v57 }
 0x18b   : > { %v477_v37 = vpop.f32.mrf.mxu2  ;;  %v519_v55 = vpop.f32.mrf.mxu3 }
 0x18c   : > { %1019 = vst [vmem:[%s1617_s27 + $0x58] sm:$0xff] %v477_v37 }
 0x18d   : > { %1031 = vst [vmem:[%s1617_s27 + $0x88] sm:$0xff] %v519_v55 }
 0x18e   : > { %v552_v58 = vpop.f32.mrf.mxu1 }
 0x18f   : > { %1040 = vst [vmem:[%s1617_s27 + $0xa0] sm:$0xff] %v552_v58 }
 0x193   : > { %v504_v38 = vpop.f32.mrf.mxu2 }
 0x194   : > { %1026 = vst [vmem:[%s1617_s27 + $0x60] sm:$0xff] %v504_v38 }
 0x196   : > { %v555_v59 = vpop.f32.mrf.mxu1 }
 0x197   : > { %1041 = vst [vmem:[%s1617_s27 + $0xa8] sm:$0xff] %v555_v59 }
 0x19b   : > { %v507_v39 = vpop.f32.mrf.mxu2 }
 0x19c   : > { %1027 = vst [vmem:[%s1617_s27 + $0x68] sm:$0xff] %v507_v39 }
 0x19e   : > { %v558_v61 = vpop.f32.mrf.mxu1 }
 0x19f   : > { %1042 = vst [vmem:[%s1617_s27 + $0xb0] sm:$0xff] %v558_v61 }
 0x1a3   : > { %v620_v40 = vpop.f32.mrf.mxu2 }
 0x1a6   : > { %v561_v0 = vpop.f32.mrf.mxu1 }
 0x1a7   : > { %1043 = vst [vmem:[%s1617_s27 + $0xb8] sm:$0xff] %v561_v0 }
 0x1ab   : > { %v623_v41 = vpop.f32.mrf.mxu2 }
 0x1ac   : > { %658 = vmatpush.msrb.mxu3 %v623_v41 }
 0x1ae   : > { %659 = vmatpush.msrb.mxu3 %v620_v40 }
 0x1af   : > { %1052 = vmatmul.msk.f32.vlgmr.msrb.gmra.mxu3 %vm320_vm0, %v1545_v14 }
 0x1b3   : > { %v626_v42 = vpop.f32.mrf.mxu2 }
 0x1b7   : > { %1053 = vmatmul.msk.f32.gmra.mxu3 %vm320_vm0, %v1559_v17 }
 0x1bb   : > { %v629_v43 = vpop.f32.mrf.mxu2 }
 0x1bc   : > { %699 = vmatpush.msra.mxu0 %v629_v43 }
 0x1be   : > { %700 = vmatpush.msra.mxu0 %v626_v42 }
 0x1bf   : > { %1054 = vmatmul.msk.f32.gmra.mxu3 %vm320_vm0, %v1531_v10  ;;  %1058 = vmatmul.msk.f32.vlgmr.msra.gmra.mxu0 %vm320_vm0, %v1545_v14 }
 0x1c3   : > { %v632_v44 = vpop.f32.mrf.mxu2 }
 0x1c7   : > { %1055 = vmatmul.msk.f32.gmra.mxu3 %vm320_vm0, %v1538_v12  ;;  %1059 = vmatmul.msk.f32.gmra.mxu0 %vm320_vm0, %v1559_v17 }
 0x1cb   : > { %v635_v45 = vpop.f32.mrf.mxu2 }
 0x1cc   : > { %741 = vmatpush.msra.mxu1 %v635_v45 }
 0x1ce   : > { %742 = vmatpush.msra.mxu1 %v632_v44 }
 0x1cf   : > { %1056 = vmatmul.msk.f32.gmra.mxu3 %vm320_vm0, %v1550_v15  ;;  %1070 = vmatmul.msk.f32.vlgmr.msra.gmra.mxu1 %vm320_vm0, %v1545_v14 }
 0x1d0   : > { %1060 = vmatmul.msk.f32.gmra.mxu0 %vm320_vm0, %v1531_v10 }
 0x1d3   : > { %v638_v46 = vpop.f32.mrf.mxu2 }
 0x1d7   : > { %1057 = vmatmul.msk.f32.gmra.mxu3 %vm320_vm0, %v1564_v18  ;;  %1071 = vmatmul.msk.f32.gmra.mxu1 %vm320_vm0, %v1559_v17 }
 0x1d8   : > { %1061 = vmatmul.msk.f32.gmra.mxu0 %vm320_vm0, %v1538_v12 }
 0x1db   : > { %v641_v47 = vpop.f32.mrf.mxu2 }
 0x1dc   : > { %783 = vmatpush.msra.mxu3 %v641_v47 }
 0x1de   : > { %784 = vmatpush.msra.mxu3 %v638_v46 }
 0x1df   : > { %1082 = vmatmul.msk.f32.vlgmr.msra.gmra.mxu3 %vm320_vm0, %v1545_v14  ;;  %1072 = vmatmul.msk.f32.gmra.mxu1 %vm320_vm0, %v1531_v10 }
 0x1e0   : > { %1062 = vmatmul.msk.f32.gmra.mxu0 %vm320_vm0, %v1550_v15 }
 0x1e7   : > { %1083 = vmatmul.msk.f32.gmra.mxu3 %vm320_vm0, %v1559_v17  ;;  %1073 = vmatmul.msk.f32.gmra.mxu1 %vm320_vm0, %v1538_v12 }
 0x1e8   : > { %1063 = vmatmul.msk.f32.gmra.mxu0 %vm320_vm0, %v1564_v18 }
 0x1ef   : > { %1084 = vmatmul.msk.f32.gmra.mxu3 %vm320_vm0, %v1531_v10  ;;  %1074 = vmatmul.msk.f32.gmra.mxu1 %vm320_vm0, %v1550_v15 }
 0x1f7   : > { %1085 = vmatmul.msk.f32.gmra.mxu3 %vm320_vm0, %v1538_v12  ;;  %1075 = vmatmul.msk.f32.gmra.mxu1 %vm320_vm0, %v1564_v18 }
 0x1ff   : > { %1086 = vmatmul.msk.f32.gmra.mxu3 %vm320_vm0, %v1550_v15 }
 0x207   : > { %1087 = vmatmul.msk.f32.gmra.mxu3 %vm320_vm0, %v1564_v18 }
 0x232   : > { %v661_v62 = vpop.f32.mrf.mxu3 }
 0x233   : > { %679 = vst [vmem:[%s1710_s10] sm:$0xff] %v661_v62 }
 0x234   : > { %1260 = shalt.err (!%p1257_p0)
}
 0x235   : > { %s1339_s0 = smov 128   ;;  %s1340_s12 = smov 8  }
 0x236   : > { %1117 = dma.vmem_to_hbm [thread:$0]  (%p1421_p11), %s831_s29, 3072, %s833_s26, %s812_s13, %s1339_s0, %s1339_s0, %s1340_s12  }
 0x237   : > { %s847_s16 = scalar_lea.hbm %s1795_s5, %s1111_s20  ;;  %s848_s14 = sshll.u32 %s1710_s10, 4  ;;  %s849_s14 = int_to_ptr.vmem [resolvable:$true] %s848_s14 }
 0x238   : > { %s850_s29 = sshll.u32 %s847_s16, 4  ;;  %s817_s26 = scalar_lea.sflag [#allocation9], %s1493_s7  ;;  %s851_s29 = int_to_ptr.hbm [resolvable:$true] %s850_s29 }
 0x239   : > { %s1275_s13 = sshra.s32 %s851_s29, 4  ;;  %s1281_s23 = scalar_lea.hbm %s1795_s5, 384  ;;  %s1276_s13 = int_to_ptr.hbm [resolvable:$true] %s1275_s13 }
 0x23a   : > { %v664_v1 = vpop.f32.mrf.mxu3  ;;  %s1277_s15 = scalar_lea.hbm %s1276_s13, 192  ;;  %p1282_p5 = scmp.lt.s32.totalorder %s1276_s13, %s1795_s5 }
 0x23b   : > { %680 = vst [vmem:[%s1710_s10 + $0x8] sm:$0xff] %v664_v1  ;;  %p1278_p1 = scmp.ne.s32.totalorder %s1276_s13, %s1277_s15  ;;  %p1283_p8 = scmp.lt.s32.totalorder %s1281_s23, %s1277_s15 }
 0x23c   : > { %v702_v2 = vpop.f32.mrf.mxu0 }
 0x23d   : > { %1064 = vst [vmem:[%s1710_s10 + $0x30] sm:$0xff] %v702_v2  ;;  %p1279_p4 = pnand %p1278_p1, %p1421_p11  ;;  %p1284_p6 = por %p1283_p8, %p1282_p5 }
 0x23f   : > { %p1280_p7 = pneg %p1279_p4 }
 0x241   : > { %p1285_p13 = pnand %p1284_p6, %p1280_p7 }
 0x242   : > { %v667_v3 = vpop.f32.mrf.mxu3 }
 0x243   : > { %681 = vst [vmem:[%s1710_s10 + $0x10] sm:$0xff] %v667_v3 }
 0x244   : > { %v705_v4 = vpop.f32.mrf.mxu0 }
 0x245   : > { %1065 = vst [vmem:[%s1710_s10 + $0x38] sm:$0xff] %v705_v4 }
 0x24a   : > { %v670_v5 = vpop.f32.mrf.mxu3 }
 0x24b   : > { %682 = vst [vmem:[%s1710_s10 + $0x18] sm:$0xff] %v670_v5 }
 0x24c   : > { %v744_v6 = vpop.f32.mrf.mxu1 }
 0x24d   : > { %1076 = vst [vmem:[%s1710_s10 + $0x60] sm:$0xff] %v744_v6  ;;  %v708_v7 = vpop.f32.mrf.mxu0 }
 0x24e   : > { %1066 = vst [vmem:[%s1710_s10 + $0x40] sm:$0xff] %v708_v7 }
 0x252   : > { %v673_v8 = vpop.f32.mrf.mxu3 }
 0x253   : > { %683 = vst [vmem:[%s1710_s10 + $0x20] sm:$0xff] %v673_v8 }
 0x254   : > { %v747_v9 = vpop.f32.mrf.mxu1 }
 0x255   : > { %1077 = vst [vmem:[%s1710_s10 + $0x68] sm:$0xff] %v747_v9  ;;  %v711_v10 = vpop.f32.mrf.mxu0 }
 0x256   : > { %1067 = vst [vmem:[%s1710_s10 + $0x48] sm:$0xff] %v711_v10 }
 0x25a   : > { %v676_v11 = vpop.f32.mrf.mxu3 }
 0x25b   : > { %684 = vst [vmem:[%s1710_s10 + $0x28] sm:$0xff] %v676_v11 }
 0x25c   : > { %v750_v12 = vpop.f32.mrf.mxu1 }
 0x25d   : > { %1078 = vst [vmem:[%s1710_s10 + $0x70] sm:$0xff] %v750_v12  ;;  %v714_v13 = vpop.f32.mrf.mxu0 }
 0x25e   : > { %1068 = vst [vmem:[%s1710_s10 + $0x50] sm:$0xff] %v714_v13 }
 0x262   : > { %v786_v14 = vpop.f32.mrf.mxu3 }
 0x263   : > { %1088 = vst [vmem:[%s1710_s10 + $0x90] sm:$0xff] %v786_v14 }
 0x264   : > { %v753_v15 = vpop.f32.mrf.mxu1 }
 0x265   : > { %1079 = vst [vmem:[%s1710_s10 + $0x78] sm:$0xff] %v753_v15  ;;  %v717_v16 = vpop.f32.mrf.mxu0 }
 0x266   : > { %1069 = vst [vmem:[%s1710_s10 + $0x58] sm:$0xff] %v717_v16 }
 0x26a   : > { %v789_v17 = vpop.f32.mrf.mxu3 }
 0x26b   : > { %1089 = vst [vmem:[%s1710_s10 + $0x98] sm:$0xff] %v789_v17 }
 0x26c   : > { %v756_v18 = vpop.f32.mrf.mxu1 }
 0x26d   : > { %1080 = vst [vmem:[%s1710_s10 + $0x80] sm:$0xff] %v756_v18 }
 0x272   : > { %v792_v19 = vpop.f32.mrf.mxu3 }
 0x273   : > { %1090 = vst [vmem:[%s1710_s10 + $0xa0] sm:$0xff] %v792_v19 }
 0x274   : > { %v759_v20 = vpop.f32.mrf.mxu1 }
 0x275   : > { %1081 = vst [vmem:[%s1710_s10 + $0x88] sm:$0xff] %v759_v20 }
 0x27a   : > { %v795_v21 = vpop.f32.mrf.mxu3 }
 0x27b   : > { %1091 = vst [vmem:[%s1710_s10 + $0xa8] sm:$0xff] %v795_v21 }
 0x282   : > { %v798_v22 = vpop.f32.mrf.mxu3 }
 0x283   : > { %1092 = vst [vmem:[%s1710_s10 + $0xb0] sm:$0xff] %v798_v22 }
 0x28a   : > { %v801_v23 = vpop.f32.mrf.mxu3 }
 0x28b   : > { %1093 = vst [vmem:[%s1710_s10 + $0xb8] sm:$0xff] %v801_v23 }
 0x28c   : > { %1288 = shalt.err (!%p1285_p13)
}
 0x28d   : > { %1118 = dma.vmem_to_hbm [thread:$0]  (%p1421_p11), %s849_s14, 3072, %s851_s29, %s817_s26, %s1339_s0, %s1339_s0, %s1340_s12  }
 0x28e PF: > { %s865_s7 = sand.u32 1, %s1323_s18   ;;  %p1809_p3 = scmp.ge.s32.totalorder %s1335_s21, 2 }
 0x28f   : > { %s866_s10 = scalar_lea.sflag [#allocation4], %s865_s7 }
 0x290   : > { %p1129_p10 = pnand %p1809_p3, %p1425_p12 }
 0x292   : > { %p1130_p2 = pneg %p1129_p10 }
 0x294   : > { %1314 = dma.done.wait (%p1130_p2), %s866_s10, 3072  }
 0x295   : > { %1316 = vsyncadd (%p1130_p2), %s866_s10, 4294964224  ;;  %s876_s25 = scalar_lea.sflag [#allocation9], %s865_s7 }
 0x296   : > { %1318 = dma.done.wait (%p1130_p2), %s876_s25, 3072  }
 0x297   : > { %1320 = vsyncadd (%p1130_p2), %s876_s25, 4294964224  ;;  %s1810_s30 = sld [smem:[#allocation14_spill]]  ;;  %p25_p11 = scmp.ge.s32.totalorder %s1396_s24, 4  }
 0x298   : > { %s1811_s20 = sld [smem:[#allocation15_spill]]  ;;  %s1812_s18 = smov %s1327_s19 }
 0x299   : > { %s1814_s21 = smov %s1396_s24  ;;  %27 = sbr.rel (!%p25_p11) target bundleno = 11 (0xb), region = 117 }
 0x29d   : > { %s1813_s19 = smov %s1810_s30 }
 0x29e   :  { %882 = vsyncpa [#allocation3], 1 }
 0x29f   :  { %884 = vsyncpa [#allocation3 + $0x1], 1 }
 0x2a0   :  { %885 = vsyncpa [#allocation6], 1 }
 0x2a1   :  { %887 = vsyncpa [#allocation6 + $0x1], 1 }
 0x2a2   :  { %888 = vsyncpa [#allocation4], 1 }
 0x2a3   :  { %890 = vsyncpa [#allocation4 + $0x1], 1 }
 0x2a4   :  { %891 = vsyncpa [#allocation9], 1 }
 0x2a5   :  { %893 = vsyncpa [#allocation9 + $0x1], 1 }

</bundles_post_ra>
